<compile_context>
chip_gen: v7x
topology: tpu7x:2x2x1
jax: 0.10.0
libtpu: 0.0.40
codegen_flags: <defaults>
</compile_context>

<pallas_src>
import math

import jax
import jax.numpy as jnp
from jax.experimental import pallas as pl
from jax.experimental.pallas import tpu as pltpu


_VMEM_LIMIT_BYTES = 48 * 1024 * 1024  # > 16/32 MiB scoped defaults, < 64 MiB (v7x)


# ----------------------------------------------------------------------------
# Pallas kernels
# ----------------------------------------------------------------------------
def _layernorm(x, g, b, eps=1e-5):
    x = x.astype(jnp.float32)
    mu = jnp.mean(x, axis=-1, keepdims=True)
    var = jnp.mean((x - mu) ** 2, axis=-1, keepdims=True)
    return (x - mu) * jax.lax.rsqrt(var + eps) * g + b


def _qkv_kernel(x_ref, ln1g_ref, ln1b_ref, wqkv_ref, bqkv_ref, o_ref):
    """pre-LN + fused QKV projection: (M, D) f32 -> (M, 3D) bf16.

    Wq / bq arrive pre-scaled by 1/sqrt(head_dim)."""
    xn = _layernorm(x_ref[...], ln1g_ref[...], ln1b_ref[...])
    qkv = jnp.dot(xn.astype(jnp.bfloat16), wqkv_ref[...],
                  preferred_element_type=jnp.float32) + bqkv_ref[...]
    o_ref[...] = qkv.astype(o_ref.dtype)


def _attention_kernel(q_ref, k_ref, v_ref, mask_ref, o_ref):
    """Causal attention, batched over the merged (batch*heads) leading dim."""
    q = q_ref[...]                                   # (BH, S, hd) bf16
    k = k_ref[...]
    v = v_ref[...]
    # scores in f32; contraction on last dims (no explicit transpose of k)
    s = jnp.einsum('bqd,bkd->bqk', q, k, preferred_element_type=jnp.float32)
    s = s + mask_ref[...]                            # additive causal bias (0 / -1e30)
    m = jnp.max(s, axis=-1, keepdims=True)
    p = jnp.exp(s - m)
    inv = pl.reciprocal(jnp.sum(p, axis=-1, keepdims=True), approx=True)
    p = (p * inv).astype(v.dtype)
    o = jnp.einsum('bqk,bkd->bqd', p, v, preferred_element_type=jnp.float32)
    o_ref[...] = o.astype(o_ref.dtype)


def _post_kernel(x_ref, attn_ref, wo_ref, bo_ref, ln2g_ref, ln2b_ref,
                 w1_ref, b1_ref, w2_ref, b2_ref, o_ref):
    """Attention out-projection + residual, then pre-LN MLP (exact GELU) + residual."""
    x = x_ref[...]                                   # (M, D) f32 residual stream
    x = x + jnp.dot(attn_ref[...], wo_ref[...],
                    preferred_element_type=jnp.float32) + bo_ref[...]
    xn = _layernorm(x, ln2g_ref[...], ln2b_ref[...])
    h = jnp.dot(xn.astype(jnp.bfloat16), w1_ref[...],
                preferred_element_type=jnp.float32) + b1_ref[...]
    h = jax.nn.gelu(h, approximate=False)            # open_clip ViT-H-14: exact GELU
    x = x + jnp.dot(h.astype(jnp.bfloat16), w2_ref[...],
                    preferred_element_type=jnp.float32) + b2_ref[...]
    o_ref[...] = x


def _ln_final_kernel(x_ref, g_ref, b_ref, o_ref):
    o_ref[...] = _layernorm(x_ref[...], g_ref[...], b_ref[...])


# ----------------------------------------------------------------------------
# pallas_call wrappers
# ----------------------------------------------------------------------------
def _full_spec(shape):
    nd = len(shape)
    return pl.BlockSpec(shape, lambda i, _nd=nd: (0,) * _nd)


def _vmem_call(kernel, out_shape, *arrays):
    """Single-step pallas_call with every operand fully resident in VMEM."""
    return pl.pallas_call(
        kernel,
        out_shape=out_shape,
        grid=(1,),
        in_specs=[_full_spec(a.shape) for a in arrays],
        out_specs=_full_spec(out_shape.shape),
        compiler_params=pltpu.CompilerParams(
            dimension_semantics=("arbitrary",),
            vmem_limit_bytes=_VMEM_LIMIT_BYTES),
    )(*arrays)


def run_block(x2d, p, mask, *, batch, seq, num_heads):
    """One CLIP ResidualAttentionBlock.  x2d: (B*S, D) f32 residual stream."""
    M, D = x2d.shape
    hd = D // num_heads

    # --- phase 1: pre-LN + fused QKV projection ---
    qkv = _vmem_call(
        _qkv_kernel,
        jax.ShapeDtypeStruct((M, 3 * D), jnp.bfloat16),
        x2d, p["ln1g"], p["ln1b"], p["wqkv"], p["bqkv"])

    # wrapper-side layout plumbing: (B*S, D) -> (B*H, S, hd)
    def split_heads(t):
        return (t.reshape(batch, seq, num_heads, hd)
                 .transpose(0, 2, 1, 3)
                 .reshape(batch * num_heads, seq, hd))

    q = split_heads(qkv[:, :D])
    k = split_heads(qkv[:, D:2 * D])
    v = split_heads(qkv[:, 2 * D:])

    # --- phase 2: head-batched causal attention ---
    attn = _vmem_call(
        _attention_kernel,
        jax.ShapeDtypeStruct((batch * num_heads, seq, hd), jnp.bfloat16),
        q, k, v, mask)

    attn = (attn.reshape(batch, num_heads, seq, hd)
                .transpose(0, 2, 1, 3)
                .reshape(M, D))

    # --- phase 3: out-projection + residual + MLP + residual ---
    return _vmem_call(
        _post_kernel,
        jax.ShapeDtypeStruct((M, D), jnp.float32),
        x2d, attn, p["wo"], p["bo"], p["ln2g"], p["ln2b"],
        p["w1"], p["b1"], p["w2"], p["b2"])


def frozen_openclip_embed(tokens, params, *, num_heads, layer_idx=0):
    """encode_with_transformer: (B, S) int32 token ids -> (B, S, D) float32."""
    B, S = tokens.shape
    D = params["token_embedding"].shape[1]

    # glue: embedding lookup + positional embedding (plain JAX)
    x = jnp.take(params["token_embedding"], tokens, axis=0)
    x = x + params["positional_embedding"][None]
    x2d = x.reshape(B * S, D).astype(jnp.float32)

    # additive causal mask built once, shared by every layer
    row = jnp.arange(S)[:, None]
    col = jnp.arange(S)[None, :]
    mask = jnp.where(col > row, -1e30, 0.0).astype(jnp.float32)

    n_blocks = len(params["blocks"])
    stop = n_blocks - layer_idx          # layer='last' -> layer_idx=0 -> all blocks
    for i, bp in enumerate(params["blocks"]):
        if i == stop:
            break
        x2d = run_block(x2d, bp, mask, batch=B, seq=S, num_heads=num_heads)

    out = _vmem_call(_ln_final_kernel,
                     jax.ShapeDtypeStruct((B * S, D), jnp.float32),
                     x2d, params["lnf_g"], params["lnf_b"])
    return out.reshape(B, S, D)


# ----------------------------------------------------------------------------
# Parameter construction (PyTorch layout) + conversion to kernel layout
# ----------------------------------------------------------------------------
def make_raw_params(key, *, vocab, seq, width, dff, n_layers):
    def nrm(k, shape, scale=0.02):
        return (scale * jax.random.normal(k, shape)).astype(jnp.float32)

    keys = jax.random.split(key, 2 + n_layers)
    raw = {
        "token_embedding": nrm(keys[0], (vocab, width)),
        "positional_embedding": nrm(keys[1], (seq, width), 0.01),
        "lnf_g": jnp.ones((width,), jnp.float32),
        "lnf_b": jnp.zeros((width,), jnp.float32),
        "blocks": [],
    }
    for li in range(n_layers):
        ks = jax.random.split(keys[2 + li], 6)
        raw["blocks"].append({
            # PyTorch layouts: Linear.weight is (out_features, in_features)
            "in_proj_w": nrm(ks[0], (3 * width, width)),
            "in_proj_b": nrm(ks[1], (3 * width,), 0.01),
            "out_proj_w": nrm(ks[2], (width, width)),
            "out_proj_b": jnp.zeros((width,), jnp.float32),
            "ln1_g": jnp.ones((width,), jnp.float32),
            "ln1_b": jnp.zeros((width,), jnp.float32),
            "ln2_g": jnp.ones((width,), jnp.float32),
            "ln2_b": jnp.zeros((width,), jnp.float32),
            "fc_w": nrm(ks[3], (dff, width)),
            "fc_b": nrm(ks[4], (dff,), 0.01),
            "proj_w": nrm(ks[5], (width, dff)),
            "proj_b": jnp.zeros((width,), jnp.float32),
        })
    return raw


def prep_params(raw, *, num_heads):
    """Convert PyTorch-layout f32 params to fused / transposed / bf16 kernel params."""
    D = raw["token_embedding"].shape[1]
    hd = D // num_heads
    scale = 1.0 / math.sqrt(hd)

    def row2(v):  # (D,) -> (1, D): keep kernel refs 2-D
        return v[None, :].astype(jnp.float32)

    params = {
        "token_embedding": raw["token_embedding"],
        "positional_embedding": raw["positional_embedding"],
        "lnf_g": row2(raw["lnf_g"]),
        "lnf_b": row2(raw["lnf_b"]),
        "blocks": [],
    }
    for rb in raw["blocks"]:
        wq, wk, wv = jnp.split(rb["in_proj_w"], 3, axis=0)   # each (D, D)
        bq, bk, bv = jnp.split(rb["in_proj_b"], 3, axis=0)
        wq = wq * scale                                      # fold 1/sqrt(hd) into q
        bq = bq * scale
        wqkv = jnp.concatenate([wq, wk, wv], axis=0).T        # (D, 3D), x @ W layout
        bqkv = jnp.concatenate([bq, bk, bv], axis=0)[None, :]
        params["blocks"].append({
            "wqkv": wqkv.astype(jnp.bfloat16),
            "bqkv": bqkv.astype(jnp.float32),
            "wo": rb["out_proj_w"].T.astype(jnp.bfloat16),
            "bo": row2(rb["out_proj_b"]),
            "ln1g": row2(rb["ln1_g"]), "ln1b": row2(rb["ln1_b"]),
            "ln2g": row2(rb["ln2_g"]), "ln2b": row2(rb["ln2_b"]),
            "w1": rb["fc_w"].T.astype(jnp.bfloat16),          # (D, Dff)
            "b1": row2(rb["fc_b"]),
            "w2": rb["proj_w"].T.astype(jnp.bfloat16),        # (Dff, D)
            "b2": row2(rb["proj_b"]),
        })
    return params


# ----------------------------------------------------------------------------
# Driver
# ----------------------------------------------------------------------------
if __name__ == "__main__":
    # small but lane-dense config: D=128 (full 128-lane), head_dim=64 (as ViT-H)
    B, S, D, H, DFF, LAYERS, VOCAB = 2, 8, 128, 2, 512, 2, 512

    key = jax.random.PRNGKey(0)
    k_tok, k_par = jax.random.split(key)
    tokens = jax.random.randint(k_tok, (B, S), 0, VOCAB, dtype=jnp.int32)
    raw = make_raw_params(k_par, vocab=VOCAB, seq=S, width=D, dff=DFF,
                          n_layers=LAYERS)
    params = prep_params(raw, num_heads=H)

    z = frozen_openclip_embed(tokens, params, num_heads=H, layer_idx=0)
    jax.block_until_ready(z)
    assert z.shape == (B, S, D) and z.dtype == jnp.float32
    print("KERNEL_OK")
</pallas_src>

<mosaic_0001>
module attributes {stable_mosaic.version = 11 : i64} {
  func.func @_qkv_kernel(%arg0: i32, %arg1: memref<16x128xf32, #tpu.memory_space<vmem>>, %arg2: memref<1x128xf32, #tpu.memory_space<vmem>>, %arg3: memref<1x128xf32, #tpu.memory_space<vmem>>, %arg4: memref<128x384xbf16, #tpu.memory_space<vmem>>, %arg5: memref<1x384xf32, #tpu.memory_space<vmem>>, %arg6: memref<16x384xbf16, #tpu.memory_space<vmem>>) attributes {dimension_semantics = [#tpu.dimension_semantics<arbitrary>], iteration_bounds = array<i64: 1>, scalar_prefetch = 0 : i64, scratch_operands = 0 : i64, tpu.core_type = #tpu.core_type<tc>, window_params = [{pipeline_mode = #tpu.pipeline_mode<synchronous>, transform_indices = @transform_0, window_bounds = array<i64: 16, 128>}, {pipeline_mode = #tpu.pipeline_mode<synchronous>, transform_indices = @transform_1, window_bounds = array<i64: 1, 128>}, {pipeline_mode = #tpu.pipeline_mode<synchronous>, transform_indices = @transform_2, window_bounds = array<i64: 1, 128>}, {pipeline_mode = #tpu.pipeline_mode<synchronous>, transform_indices = @transform_3, window_bounds = array<i64: 128, 384>}, {pipeline_mode = #tpu.pipeline_mode<synchronous>, transform_indices = @transform_4, window_bounds = array<i64: 1, 384>}, {pipeline_mode = #tpu.pipeline_mode<synchronous>, transform_indices = @transform_5, window_bounds = array<i64: 16, 384>}]} {
    %c0 = arith.constant 0 : index
    %c0_0 = arith.constant 0 : index
    %0 = vector.load %arg1[%c0, %c0_0] : memref<16x128xf32, #tpu.memory_space<vmem>>, vector<16x128xf32>
    %c0_1 = arith.constant 0 : index
    %c0_2 = arith.constant 0 : index
    %1 = vector.load %arg2[%c0_1, %c0_2] : memref<1x128xf32, #tpu.memory_space<vmem>>, vector<1x128xf32>
    %c0_3 = arith.constant 0 : index
    %c0_4 = arith.constant 0 : index
    %2 = vector.load %arg3[%c0_3, %c0_4] : memref<1x128xf32, #tpu.memory_space<vmem>>, vector<1x128xf32>
    %cst = arith.constant dense<0.000000e+00> : vector<16xf32>
    %3 = vector.multi_reduction <add>, %0, %cst [1] : vector<16x128xf32> to vector<16xf32>
    %4 = vector.shape_cast %3 : vector<16xf32> to vector<16x1xf32>
    %cst_5 = arith.constant 1.280000e+02 : f32
    %5 = vector.broadcast %cst_5 : f32 to vector<16x1xf32>
    %6 = arith.divf %4, %5 : vector<16x1xf32>
    %7 = vector.broadcast %6 : vector<16x1xf32> to vector<16x128xf32>
    %8 = arith.subf %0, %7 : vector<16x128xf32>
    %9 = arith.mulf %8, %8 : vector<16x128xf32>
    %cst_6 = arith.constant dense<0.000000e+00> : vector<16xf32>
    %10 = vector.multi_reduction <add>, %9, %cst_6 [1] : vector<16x128xf32> to vector<16xf32>
    %11 = vector.shape_cast %10 : vector<16xf32> to vector<16x1xf32>
    %cst_7 = arith.constant 1.280000e+02 : f32
    %12 = vector.broadcast %cst_7 : f32 to vector<16x1xf32>
    %13 = arith.divf %11, %12 : vector<16x1xf32>
    %14 = vector.broadcast %6 : vector<16x1xf32> to vector<16x128xf32>
    %15 = arith.subf %0, %14 : vector<16x128xf32>
    %cst_8 = arith.constant 9.99999974E-6 : f32
    %16 = vector.broadcast %cst_8 : f32 to vector<16x1xf32>
    %17 = arith.addf %13, %16 : vector<16x1xf32>
    %18 = math.rsqrt %17 : vector<16x1xf32>
    %19 = vector.broadcast %18 : vector<16x1xf32> to vector<16x128xf32>
    %20 = arith.mulf %15, %19 : vector<16x128xf32>
    %21 = vector.broadcast %1 : vector<1x128xf32> to vector<16x128xf32>
    %22 = arith.mulf %20, %21 : vector<16x128xf32>
    %23 = vector.broadcast %2 : vector<1x128xf32> to vector<16x128xf32>
    %24 = arith.addf %22, %23 : vector<16x128xf32>
    %25 = arith.truncf %24 : vector<16x128xf32> to vector<16x128xbf16>
    %c0_9 = arith.constant 0 : index
    %c0_10 = arith.constant 0 : index
    %26 = vector.load %arg4[%c0_9, %c0_10] : memref<128x384xbf16, #tpu.memory_space<vmem>>, vector<128x384xbf16>
    %cst_11 = arith.constant dense<0.000000e+00> : vector<16x384xf32>
    %27 = tpu.matmul %25, %26, %cst_11 {dimension_numbers = #tpu.dot_dimension_numbers<[1], [0], [0], [1], [0, 0, 1, 1], [], []>} : vector<16x128xbf16>, vector<128x384xbf16>, vector<16x384xf32> -> vector<16x384xf32>
    %c0_12 = arith.constant 0 : index
    %c0_13 = arith.constant 0 : index
    %28 = vector.load %arg5[%c0_12, %c0_13] : memref<1x384xf32, #tpu.memory_space<vmem>>, vector<1x384xf32>
    %29 = vector.broadcast %28 : vector<1x384xf32> to vector<16x384xf32>
    %30 = arith.addf %27, %29 : vector<16x384xf32>
    %31 = arith.truncf %30 : vector<16x384xf32> to vector<16x384xbf16>
    %c0_14 = arith.constant 0 : index
    %c0_15 = arith.constant 0 : index
    %32 = vector.load %arg6[%c0_14, %c0_15] : memref<16x384xbf16, #tpu.memory_space<vmem>>, vector<16x384xbf16>
    tpu.vector_store %arg6[%c0_14, %c0_15], %31 {strides = array<i32>} : memref<16x384xbf16, #tpu.memory_space<vmem>>, vector<16x384xbf16>,
    return
  }
  func.func @transform_0(%arg0: i32) -> (i32, i32) {
    %c0_i32 = arith.constant 0 : i32
    %c0_i32_0 = arith.constant 0 : i32
    %c0_i32_1 = arith.constant 0 : i32
    return %c0_i32, %c0_i32_0 : i32, i32
  }
  func.func @transform_1(%arg0: i32) -> (i32, i32) {
    %c0_i32 = arith.constant 0 : i32
    %c0_i32_0 = arith.constant 0 : i32
    %c0_i32_1 = arith.constant 0 : i32
    return %c0_i32, %c0_i32_0 : i32, i32
  }
  func.func @transform_2(%arg0: i32) -> (i32, i32) {
    %c0_i32 = arith.constant 0 : i32
    %c0_i32_0 = arith.constant 0 : i32
    %c0_i32_1 = arith.constant 0 : i32
    return %c0_i32, %c0_i32_0 : i32, i32
  }
  func.func @transform_3(%arg0: i32) -> (i32, i32) {
    %c0_i32 = arith.constant 0 : i32
    %c0_i32_0 = arith.constant 0 : i32
    %c0_i32_1 = arith.constant 0 : i32
    return %c0_i32, %c0_i32_0 : i32, i32
  }
  func.func @transform_4(%arg0: i32) -> (i32, i32) {
    %c0_i32 = arith.constant 0 : i32
    %c0_i32_0 = arith.constant 0 : i32
    %c0_i32_1 = arith.constant 0 : i32
    return %c0_i32, %c0_i32_0 : i32, i32
  }
  func.func @transform_5(%arg0: i32) -> (i32, i32) {
    %c0_i32 = arith.constant 0 : i32
    %c0_i32_0 = arith.constant 0 : i32
    %c0_i32_1 = arith.constant 0 : i32
    return %c0_i32, %c0_i32_0 : i32, i32
  }
}

</mosaic_0001>

<bundles_post_ra>
// kernel: tpu_custom_call.1
= control target key start
LH: loop header
LB: loop body
LE: loop exit
PB: predicated region body
PF: predicated region fallthrough
CT: control target
= control target key end

     0   :  { %10 = vsyncpa [#allocation3], 0  ;;  %s688_s0 = inlined_call_operand.hbm [shape: f32[16,128], index: 0, kind: input, shape index: {}]   ;;  %s689_s1 = inlined_call_operand.vmem [shape: f32[1,128], index: 1, kind: input, shape index: {}]   ;;  %s690_s2 = inlined_call_operand.vmem [shape: f32[1,128], index: 2, kind: input, shape index: {}]   ;;  %s691_s3 = inlined_call_operand.hbm [shape: bf16[128,384], index: 3, kind: input, shape index: {}]   ;;  %s692_s4 = inlined_call_operand.vmem [shape: f32[1,384], index: 4, kind: input, shape index: {}]   ;;  %s693_s5 = inlined_call_operand.hbm [shape: bf16[16,384], index: 5, kind: output, shape index: {}]  }
   0x1   :  { %11 = vsyncpa [#allocation6], 0 }
   0x2   :  { %12 = vsyncpa [#allocation4], 0  ;;  %s578_s18 = smov [#allocation2]   ;;  %s506_s22 = scalar_lea.hbm %s688_s0, 256 }
   0x3   :  { %s18_s19 = sshll.u32 %s578_s18, 4  ;;  %p507_p0 = scmp.ne.s32.totalorder %s688_s0, %s506_s22  ;;  %s19_s19 = int_to_ptr.vmem [resolvable:$true] %s18_s19 }
   0x4   :  { %p510_p1 = scmp.lt.u32.totalorder %s506_s22, %s688_s0 }
   0x6   :  { %p512_p2 = pnand %p510_p1, %p507_p0 }
   0x8   :  { %515 = shalt.err (!%p512_p2)
}
   0x9   :  { %s516_s27 = scalar_lea.vmem %s19_s19, 256  ;;  %p521_p4 = scmp.lt.s32.totalorder %s19_s19, %s19_s19 }
   0xa   :  { %p517_p3 = scmp.ne.s32.totalorder %s19_s19, %s516_s27  ;;  %p522_p5 = scmp.lt.s32.totalorder %s516_s27, %s516_s27 }
   0xc   :  { %p523_p6 = por %p522_p5, %p521_p4 }
   0xe   :  { %p524_p7 = pnand %p523_p6, %p517_p3 }
  0x10   :  { %527 = shalt.err (!%p524_p7)
}
  0x11   :  { %s579_s28 = smov 128   ;;  %s580_s29 = smov 8  }
  0x12   :  { %24 = dma.hbm_to_vmem [thread:$0]  %s688_s0, 256, %s19_s19, [#allocation3], %s579_s28, %s579_s28, %s580_s29  }
  0x13   :  { %s581_s7 = smov [#allocation5]   ;;  %s528_s11 = scalar_lea.hbm %s691_s3, 3072 }
  0x14   :  { %s34_s8 = sshll.u32 %s581_s7, 4  ;;  %p529_p8 = scmp.ne.s32.totalorder %s691_s3, %s528_s11  ;;  %s35_s8 = int_to_ptr.vmem [resolvable:$true] %s34_s8 }
  0x15   :  { %p532_p9 = scmp.lt.u32.totalorder %s528_s11, %s691_s3 }
  0x17   :  { %p534_p10 = pnand %p532_p9, %p529_p8 }
  0x19   :  { %537 = shalt.err (!%p534_p10)
}
  0x1a   :  { %s538_s16 = scalar_lea.vmem %s35_s8, 3072  ;;  %p543_p12 = scmp.lt.s32.totalorder %s35_s8, %s35_s8 }
  0x1b   :  { %p539_p11 = scmp.ne.s32.totalorder %s35_s8, %s538_s16  ;;  %p544_p13 = scmp.lt.s32.totalorder %s538_s16, %s538_s16 }
  0x1d   :  { %p545_p0 = por %p544_p13, %p543_p12 }
  0x1f   :  { %p546_p1 = pnand %p545_p0, %p539_p11 }
  0x21   :  { %549 = shalt.err (!%p546_p1)
}
  0x22   :  { %s582_s0 = smov 192   ;;  %s583_s17 = smov 12  }
  0x23   :  { %40 = dma.hbm_to_vmem [thread:$0]  %s691_s3, 3072, %s35_s8, [#allocation6], %s582_s0, %s582_s0, %s583_s17  }
  0x24   :  { %572 = dma.done.wait [#allocation3], 256  }
  0x25   :  { %573 = vsyncadd [#allocation3], 4294967040 }
  0x26   :  { %574 = dma.done.wait [#allocation6], 3072  }
  0x27   :  { %575 = vsyncadd [#allocation6], 4294964224  ;;  %v50_v0 = vld [vmem:[#allocation2] sm:$0xff]  ;;  %v51_v1 = vld [vmem:[#allocation2 + $0x8] sm:$0xff]  ;;  %v584_v4 = vmov 0.0   ;;  %v585_v30 = vmov 0   ;;  %v128_v53 = vlaneseq }
  0x28   :  { %54 = vadd.xlane.f32.xlu0 %v50_v0  ;;  %v470_v2 = vld [vmem:[#allocation5 + $0x4] ss:$12 sps:$4 sm:$0xff]   ;;  %v472_v3 = vld [vmem:[#allocation5] ss:$12 sps:$4 sm:$0xff]   ;;  %440 = vmatprep.subr.bf16.mxu1 %v584_v4  ;;  %v473_v5 = vld [vmem:[#allocation5 + $0x8] ss:$12 sps:$4 sm:$0xff]  }
  0x29   :  { %v474_v6 = vld [vmem:[#allocation5 + $0x1c] ss:$12 sps:$4 sm:$0xff]   ;;  %271 = vmatprep.subr.bf16.mxu0 %v470_v2  ;;  %441 = vmatpush3.bf16.msra.mxu1 %v473_v5  ;;  %v476_v15 = vld [vmem:[#allocation5 + $0x18] ss:$12 sps:$4 sm:$0xff]   ;;  %v477_v16 = vld [vmem:[#allocation5 + $0x20] ss:$12 sps:$4 sm:$0xff]  }
  0x2a   :  { %272 = vmatpush1.bf16.msra.mxu0 %v472_v3  ;;  %442 = vmatprep.subr.bf16.mxu1 %v584_v4  ;;  %v478_v17 = vld [vmem:[#allocation5 + $0x34] ss:$12 sps:$4 sm:$0xff]   ;;  %v480_v18 = vld [vmem:[#allocation5 + $0x30] ss:$12 sps:$4 sm:$0xff]   ;;  %v481_v19 = vld [vmem:[#allocation5 + $0x38] ss:$12 sps:$4 sm:$0xff]  }
  0x2b   :  { %273 = vmatprep.subr.bf16.mxu0 %v474_v6  ;;  %v482_v20 = vld [vmem:[#allocation5 + $0x4c] ss:$12 sps:$4 sm:$0xff]   ;;  %v484_v21 = vld [vmem:[#allocation5 + $0x48] ss:$12 sps:$4 sm:$0xff]   ;;  %v485_v22 = vld [vmem:[#allocation5 + $0x50] ss:$12 sps:$4 sm:$0xff]   ;;  %303 = vmatprep.mubr.bf16.mxu0 %v585_v30 }
  0x2c   :  { %56 = vadd.xlane.f32.xlu0 %v51_v1  ;;  %v486_v23 = vld [vmem:[#allocation5 + $0x64] ss:$12 sps:$4 sm:$0xff]   ;;  %v488_v24 = vld [vmem:[#allocation5 + $0x60] ss:$12 sps:$4 sm:$0xff]   ;;  %v489_v25 = vld [vmem:[#allocation5 + $0x68] ss:$12 sps:$4 sm:$0xff]  }
  0x2d   :  { %443 = vmatpush3.bf16.msra.mxu1 %v477_v16  ;;  %v490_v26 = vld [vmem:[#allocation5 + $0x7c] ss:$12 sps:$4 sm:$0xff]   ;;  %v492_v27 = vld [vmem:[#allocation5 + $0x78] ss:$12 sps:$4 sm:$0xff]   ;;  %v493_v28 = vld [vmem:[#allocation5 + $0x80] ss:$12 sps:$4 sm:$0xff]  }
  0x2e   :  { %274 = vmatpush1.bf16.msra.mxu0 %v476_v15  ;;  %444 = vmatprep.subr.bf16.mxu1 %v584_v4  ;;  %v494_v29 = vld [vmem:[#allocation5 + $0x94] ss:$12 sps:$4 sm:$0xff]   ;;  %vm586_vm0 = vmmov 0   ;;  %v496_v31 = vld [vmem:[#allocation5 + $0x90] ss:$12 sps:$4 sm:$0xff]   ;;  %v129_v54 = vshrl.u32 %v128_v53, 7 }
  0x2f   :  { %275 = vmatprep.subr.bf16.mxu0 %v478_v17  ;;  %456 = vmatprep.mubr.msk.bf16.mxu1 %vm586_vm0, %v584_v4  ;;  %v497_v32 = vld [vmem:[#allocation5 + $0x98] ss:$12 sps:$4 sm:$0xff]   ;;  %v500_v34 = vld [vmem:[#allocation5 + $0xa8] ss:$12 sps:$4 sm:$0xff]   ;;  %v501_v35 = vld [vmem:[#allocation5 + $0xb0] ss:$12 sps:$4 sm:$0xff]  }
  0x30   :  { %v498_v33 = vld [vmem:[#allocation5 + $0xac] ss:$12 sps:$4 sm:$0xff]   ;;  %v397_v44 = vld [vmem:[%s689_s1] ss:$0 sm:$0xff]  ;;  %v130_v55 = vsub.s32 0, %v129_v54  ;;  %v138_v56 = vsub.s32 2, %v129_v54 }
  0x31   :  { %445 = vmatpush3.bf16.msra.mxu1 %v481_v19  ;;  %v398_v48 = vld [vmem:[%s690_s2] ss:$0 sm:$0xff]  ;;  %v134_v58 = vsub.s32 1, %v129_v54  ;;  %s587_s2 = smov [#allocation7]  }
  0x32   :  { %276 = vmatpush1.bf16.msra.mxu0 %v480_v18  ;;  %446 = vmatprep.subr.bf16.mxu1 %v584_v4  ;;  %v126_v57 = vld [vmem:[%s692_s4] sm:$0x7]  ;;  %s384_s4 = sshll.u32 %s587_s2, 4  ;;  %s385_s4 = int_to_ptr.vmem [resolvable:$true] %s384_s4 }
  0x33   :  { %277 = vmatprep.subr.bf16.mxu0 %v482_v20  ;;  %v131_v59 = vrot.slane %v126_v57, %v130_v55  ;;  %v139_v60 = vrot.slane %v126_v57, %v138_v56  ;;  %v135_v61 = vrot.slane %v126_v57, %v134_v58  ;;  %s550_s24 = scalar_lea.vmem %s385_s4, 384  ;;  %p555_p3 = scmp.lt.s32.totalorder %s385_s4, %s385_s4 }
  0x34   :  { %p551_p2 = scmp.ne.s32.totalorder %s385_s4, %s550_s24  ;;  %p556_p4 = scmp.lt.s32.totalorder %s550_s24, %s550_s24 }
  0x35   :  { %447 = vmatpush3.bf16.msra.mxu1 %v485_v22 }
  0x36   :  { %278 = vmatpush1.bf16.msra.mxu0 %v484_v21  ;;  %448 = vmatprep.subr.bf16.mxu1 %v584_v4  ;;  %p557_p5 = por %p556_p4, %p555_p3 }
  0x37   :  { %279 = vmatprep.subr.bf16.mxu0 %v486_v23 }
  0x38   :  { %p558_p6 = pnand %p557_p5, %p551_p2 }
  0x39   :  { %449 = vmatpush3.bf16.msra.mxu1 %v489_v25 }
  0x3a   :  { %280 = vmatpush1.bf16.msra.mxu0 %v488_v24  ;;  %450 = vmatprep.subr.bf16.mxu1 %v584_v4 }
  0x3b   :  { %281 = vmatprep.subr.bf16.mxu0 %v490_v26 }
  0x3d   :  { %451 = vmatpush3.bf16.msra.mxu1 %v493_v28 }
  0x3e   :  { %282 = vmatpush1.bf16.msra.mxu0 %v492_v27  ;;  %452 = vmatprep.subr.bf16.mxu1 %v584_v4 }
  0x3f   :  { %283 = vmatprep.subr.bf16.mxu0 %v494_v29 }
  0x41   :  { %453 = vmatpush3.bf16.msra.mxu1 %v497_v32 }
  0x42   :  { %284 = vmatpush1.bf16.msra.mxu0 %v496_v31  ;;  %454 = vmatprep.subr.bf16.mxu1 %v584_v4 }
  0x43   :  { %285 = vmatprep.subr.bf16.mxu0 %v498_v33 }
  0x45   :  { %455 = vmatpush3.bf16.msra.mxu1 %v501_v35 }
  0x46   :  { %286 = vmatpush1.bf16.msra.mxu0 %v500_v34 }
  0xb5   :  { %v55_v7 = vpop.xlane.xlu0 %54 }
  0xb6   :  { %v59_v8 = vmul.f32 0.0078125, %v55_v7 }
  0xb8   :  { %v647_v9 = vsub.f32 %v50_v0, %v59_v8 }
  0xb9   :  { %v57_v10 = vpop.xlane.xlu0 %56 }
  0xba   :  { %v60_v11 = vmul.f32 0.0078125, %v57_v10  ;;  %v63_v12 = vmul.f32 %v647_v9, %v647_v9 }
  0xbc   :  { %v651_v13 = vsub.f32 %v51_v1, %v60_v11  ;;  %65 = vadd.xlane.f32.xlu1 %v63_v12 }
  0xbe   :  { %v64_v14 = vmul.f32 %v651_v13, %v651_v13 }
  0xc0   :  { %67 = vadd.xlane.f32.xlu1 %v64_v14 }
 0x149   :  { %v66_v36 = vpop.xlane.xlu1 %65 }
 0x14a   :  { %v69_v37 = vmul.f32 0.0078125, %v66_v36 }
 0x14c   :  { %v71_v38 = vadd.f32 1e-05, %v69_v37 }
 0x14d   :  { %v68_v39 = vpop.xlane.xlu1 %67 }
 0x14e   :  { %502 = vrsqrt.f32 %v71_v38  ;;  %v70_v40 = vmul.f32 0.0078125, %v68_v39 }
 0x150   :  { %v72_v41 = vadd.f32 1e-05, %v70_v40 }
 0x152   :  { %504 = vrsqrt.f32 %v72_v41 }
 0x158   :  { %v503_v42 = vpop.eup %502 }
 0x159   :  { %v75_v43 = vmul.f32 %v503_v42, %v647_v9 }
 0x15b   :  { %v83_v47 = vmul.f32 %v397_v44, %v75_v43 }
 0x15c   :  { %v505_v45 = vpop.eup %504 }
 0x15d   :  { %v76_v46 = vmul.f32 %v505_v45, %v651_v13  ;;  %v91_v50 = vadd.f32 %v398_v48, %v83_v47 }
 0x15f   :  { %v84_v49 = vmul.f32 %v397_v44, %v76_v46 }
 0x161   :  { %v92_v51 = vadd.f32 %v398_v48, %v84_v49 }
 0x163   :  { %v93_v52 = vpack.c.bf16 %v92_v51, %v91_v50 }
 0x165   :  { %304 = vmatmul.mubr.bf16.vlgmr.msra.gmra.mrb[0].mxu0 %v93_v52  ;;  %457 = vmatmul.mubr.bf16.vlgmr.msra.gmra.mrb[0].mxu1 %v93_v52 }
 0x238   :  { %v305_v62 = vpop.f32.mrb[0].mxu0  ;;  %v348_v63 = vpop.f32.mrb[0].mxu1 }
 0x239   :  { %v306_v0 = vadd.f32 %v305_v62, %v131_v59  ;;  %v349_v1 = vadd.f32 %v348_v63, %v139_v60  ;;  %v307_v2 = vpop.f32.mrb[1].mxu0  ;;  %v458_v3 = vpop.f32.mrb[1].mxu1 }
 0x23a   :  { %v308_v4 = vadd.f32 %v307_v2, %v135_v61  ;;  %v309_v5 = vpop.f32.mrb[2].mxu0  ;;  %v351_v6 = vpop.f32.mrb[2].mxu1 }
 0x23b   :  { %v428_v7 = vpack.c.bf16 %v349_v1, %v349_v1  ;;  %v310_v8 = vadd.f32 %v309_v5, %v131_v59  ;;  %v352_v9 = vadd.f32 %v351_v6, %v139_v60  ;;  %v311_v10 = vpop.f32.mrb[3].mxu0  ;;  %v459_v11 = vpop.f32.mrb[3].mxu1 }
 0x23c   :  { %v427_v12 = vpack.c.bf16 %v308_v4, %v306_v0  ;;  %v312_v13 = vadd.f32 %v311_v10, %v135_v61 }
 0x23d   :  { %376 = vst [vmem:[#allocation7 + $0x8] sm:$0xf] %v428_v7  ;;  %v430_v14 = vpack.c.bf16 %v352_v9, %v352_v9 }
 0x23e   :  { %375 = vst [vmem:[#allocation7] sm:$0xff] %v427_v12  ;;  %v429_v15 = vpack.c.bf16 %v312_v13, %v310_v8 }
 0x23f   :  { %378 = vst [vmem:[#allocation7 + $0x14] sm:$0xf] %v430_v14 }
 0x240   :  { %377 = vst [vmem:[#allocation7 + $0xc] sm:$0xff] %v429_v15 }
 0x241   :  { %561 = shalt.err (!%p558_p6)
}
 0x242   :  { %s562_s27 = scalar_lea.hbm %s693_s5, 384 }
 0x243   :  { %p563_p7 = scmp.ne.s32.totalorder %s693_s5, %s562_s27  ;;  %p566_p8 = scmp.lt.u32.totalorder %s562_s27, %s693_s5 }
 0x245   :  { %p568_p9 = pnand %p566_p8, %p563_p7 }
 0x247   :  { %571 = shalt.err (!%p568_p9)
}
 0x248   :  { %390 = dma.vmem_to_hbm [thread:$0]  %s385_s4, 384, %s693_s5, [#allocation4], %s582_s0, %s582_s0, %s583_s17  }
 0x249   :  { %576 = dma.done.wait [#allocation4], 384  }
 0x24a   :  { %577 = vsyncadd [#allocation4], 4294966912 }
 0x24b   :  { %394 = vsyncpa [#allocation3], 1 }
 0x24c   :  { %395 = vsyncpa [#allocation6], 1 }
 0x24d   :  { %396 = vsyncpa [#allocation4], 1 }

</bundles_post_ra>
